<compile_context>
chip_gen: v6e
topology: v6e:2x2x1
jax: 0.10.0
libtpu: 0.0.40
codegen_flags: <defaults>
</compile_context>

<pallas_src>
import math

import jax
import jax.numpy as jnp
from jax import lax
from jax.experimental import pallas as pl
from jax.experimental.pallas import tpu as pltpu


# ----------------------------- configuration -------------------------------
B = 2            # batch
L_NEW = 8        # latent sequence length (lma_config.L_new)
D_NEW = 32       # latent feature dim (lma_config.d_new)
N_HEADS = 4      # lma_config.num_heads_latent
HEAD_DIM = D_NEW // N_HEADS
FF_HIDDEN = 64   # ff_latent_hidden
LN_EPS = 1e-5
BL = B * L_NEW   # fused (batch * latent-seq) rows

# ----- packed parameter slab layout (single (SLAB_ROWS, SLAB_LANES) f32 buffer) -----
SLAB_LANES = 6 * D_NEW          # 192 = q | k | v'_0 | v'_1 | v'_2 | v'_3
ROW_QKV_W = 0                   # rows [0:32)   lanes [0:192) : fused QKV weight (proj folded, scale folded)
ROW_FC_W = 32                   # rows [32:64)  lanes [0:64)  : fc weight  (32, 64)
ROW_FC2_W = 64                  # rows [64:128) lanes [0:32)  : fc2 weight (64, 32)
ROW_VEC = 128                   # rows [128:136): vector block (one row each, lane offset 0)
(VEC_QKV_B, VEC_LN1_W, VEC_LN1_B, VEC_LN2_W, VEC_LN2_B,
 VEC_PROJ_B, VEC_FC_B, VEC_FC2_B) = range(8)
SLAB_ROWS = ROW_VEC + 8         # 136


def _layernorm(x, w, b):
    # x: (R, D); w, b: (1, D). Matches F.layer_norm (biased variance, eps=1e-5).
    mean = jnp.mean(x, axis=-1, keepdims=True)
    xc = x - mean
    var = jnp.mean(xc * xc, axis=-1, keepdims=True)
    inv = lax.rsqrt(var + LN_EPS)
    return xc * inv * w + b


def _gelu_exact(x):
    # PyTorch nn.GELU() default = exact erf formulation.
    return 0.5 * x * (1.0 + lax.erf(x * (1.0 / math.sqrt(2.0))))


# --------------------------------- kernel ----------------------------------
def lma_block_kernel(z_ref, p_ref, out_ref):
    z = z_ref[...]                                             # (BL, D)

    # Vector parameters: one aligned (8, 192) load, then cheap value slices.
    vecs = p_ref[ROW_VEC:SLAB_ROWS, :]                         # (8, 192)
    b_qkvf = vecs[VEC_QKV_B:VEC_QKV_B + 1, :]                  # (1, 192)
    ln1_w = vecs[VEC_LN1_W:VEC_LN1_W + 1, 0:D_NEW]
    ln1_b = vecs[VEC_LN1_B:VEC_LN1_B + 1, 0:D_NEW]
    ln2_w = vecs[VEC_LN2_W:VEC_LN2_W + 1, 0:D_NEW]
    ln2_b = vecs[VEC_LN2_B:VEC_LN2_B + 1, 0:D_NEW]
    proj_b = vecs[VEC_PROJ_B:VEC_PROJ_B + 1, 0:D_NEW]
    fc_b = vecs[VEC_FC_B:VEC_FC_B + 1, 0:FF_HIDDEN]
    fc2_b = vecs[VEC_FC2_B:VEC_FC2_B + 1, 0:D_NEW]

    # ---- Attention branch: z + Attn(LN1(z)) ----
    x = _layernorm(z, ln1_w, ln1_b)
    # Fused QKV + folded-projection matmul: (BL,32) @ (32,192).
    qkv = jnp.dot(x, p_ref[ROW_QKV_W:ROW_QKV_W + D_NEW, :],
                  preferred_element_type=jnp.float32) + b_qkvf  # (BL, 192)

    # Block-diagonal batch mask (L_NEW is a power of two -> xor trick, one compare).
    ri = lax.broadcasted_iota(jnp.int32, (BL, BL), 0)
    ci = lax.broadcasted_iota(jnp.int32, (BL, BL), 1)
    same_block = (ri ^ ci) < L_NEW                              # (BL, BL) bool

    # Phase 1: all head score matmuls back-to-back (contract last dims; no k.T,
    # 1/sqrt(head_dim) already folded into Wq/bq at pack time).
    scores = []
    for h in range(N_HEADS):
        qh = qkv[:, h * HEAD_DIM:(h + 1) * HEAD_DIM]
        kh = qkv[:, D_NEW + h * HEAD_DIM: D_NEW + (h + 1) * HEAD_DIM]
        scores.append(lax.dot_general(
            qh, kh, dimension_numbers=(((1,), (1,)), ((), ())),
            preferred_element_type=jnp.float32))                # (BL, BL)

    # Phase 2: masked softmax per head. Row max over the full fused row is valid
    # (softmax is shift invariant; cross-batch terms are zeroed post-exp).
    probs = []
    for s in scores:
        m = jnp.max(s, axis=-1, keepdims=True)
        e = jnp.where(same_block, jnp.exp(s - m), 0.0)
        r = pl.reciprocal(jnp.sum(e, axis=-1, keepdims=True), approx=True)
        probs.append(e * r)

    # Phase 3: AV' dots (projection already folded into V'), back-to-back,
    # single running accumulation (MRB-friendly on v7x).
    att = jnp.dot(probs[0], qkv[:, 2 * D_NEW:3 * D_NEW],
                  preferred_element_type=jnp.float32)
    for h in range(1, N_HEADS):
        vh = qkv[:, (2 + h) * D_NEW:(3 + h) * D_NEW]
        att = att + jnp.dot(probs[h], vh, preferred_element_type=jnp.float32)
    z1 = z + att + proj_b

    # ---- MLP branch: z + MLP(LN2(z)) ----
    x2 = _layernorm(z1, ln2_w, ln2_b)
    h1 = jnp.dot(x2, p_ref[ROW_FC_W:ROW_FC_W + D_NEW, 0:FF_HIDDEN],
                 preferred_element_type=jnp.float32) + fc_b
    h1 = _gelu_exact(h1)
    h2 = jnp.dot(h1, p_ref[ROW_FC2_W:ROW_FC2_W + FF_HIDDEN, 0:D_NEW],
                 preferred_element_type=jnp.float32) + fc2_b
    out_ref[...] = z1 + h2


# ------------------------ parameter packing (one-time) ----------------------
def pack_params(params):
    """Fold scale + output projection into the QKV weight and pack all params
    into a single (SLAB_ROWS, SLAB_LANES) f32 slab (one DMA)."""
    (ln1_w, ln1_b, attn_w, attn_b, proj_w, proj_b,
     ln2_w, ln2_b, fc_w, fc_b, fc2_w, fc2_b) = params
    scale = 1.0 / math.sqrt(HEAD_DIM)

    wq = attn_w[:, 0 * D_NEW:1 * D_NEW] * scale
    wk = attn_w[:, 1 * D_NEW:2 * D_NEW]
    wv = attn_w[:, 2 * D_NEW:3 * D_NEW]
    bq = attn_b[:, 0 * D_NEW:1 * D_NEW] * scale
    bk = attn_b[:, 1 * D_NEW:2 * D_NEW]
    bv = attn_b[:, 2 * D_NEW:3 * D_NEW]

    # Fold output projection into V per head: Wv'_h = Wv_h @ Wp_h, bv'_h = bv_h @ Wp_h.
    wv_f, bv_f = [], []
    for h in range(N_HEADS):
        sl = slice(h * HEAD_DIM, (h + 1) * HEAD_DIM)
        wv_f.append(wv[:, sl] @ proj_w[sl, :])   # (32, 32)
        bv_f.append(bv[:, sl] @ proj_w[sl, :])   # (1, 32)
    w_qkvf = jnp.concatenate([wq, wk] + wv_f, axis=1)   # (32, 192)
    b_qkvf = jnp.concatenate([bq, bk] + bv_f, axis=1)   # (1, 192)

    slab = jnp.zeros((SLAB_ROWS, SLAB_LANES), jnp.float32)
    slab = slab.at[ROW_QKV_W:ROW_QKV_W + D_NEW, :].set(w_qkvf)
    slab = slab.at[ROW_FC_W:ROW_FC_W + D_NEW, 0:FF_HIDDEN].set(fc_w)
    slab = slab.at[ROW_FC2_W:ROW_FC2_W + FF_HIDDEN, 0:D_NEW].set(fc2_w)
    slab = slab.at[ROW_VEC + VEC_QKV_B, :].set(b_qkvf[0])
    slab = slab.at[ROW_VEC + VEC_LN1_W, 0:D_NEW].set(ln1_w[0])
    slab = slab.at[ROW_VEC + VEC_LN1_B, 0:D_NEW].set(ln1_b[0])
    slab = slab.at[ROW_VEC + VEC_LN2_W, 0:D_NEW].set(ln2_w[0])
    slab = slab.at[ROW_VEC + VEC_LN2_B, 0:D_NEW].set(ln2_b[0])
    slab = slab.at[ROW_VEC + VEC_PROJ_B, 0:D_NEW].set(proj_b[0])
    slab = slab.at[ROW_VEC + VEC_FC_B, 0:FF_HIDDEN].set(fc_b[0])
    slab = slab.at[ROW_VEC + VEC_FC2_B, 0:D_NEW].set(fc2_b[0])
    return slab


# --------------------------------- wrapper ----------------------------------
def lma_block_pallas(z, param_slab):
    z2d = z.reshape(BL, D_NEW)   # fuse batch into the sublane axis

    out2d = pl.pallas_call(
        lma_block_kernel,
        out_shape=jax.ShapeDtypeStruct((BL, D_NEW), z.dtype),
        grid_spec=pltpu.PrefetchScalarGridSpec(
            num_scalar_prefetch=0,
            grid=(1,),   # whole problem (all batches) in one grid step
            in_specs=[
                pl.BlockSpec((BL, D_NEW), lambda i: (0, 0)),
                pl.BlockSpec((SLAB_ROWS, SLAB_LANES), lambda i: (0, 0)),
            ],
            out_specs=pl.BlockSpec((BL, D_NEW), lambda i: (0, 0)),
        ),
        input_output_aliases={0: 0},   # reuse z's HBM buffer for the output
        compiler_params=pltpu.CompilerParams(
            dimension_semantics=("arbitrary",)),
    )(z2d, param_slab)

    return out2d.reshape(B, L_NEW, D_NEW)


# ------------------------- pure-JAX reference ------------------------------
def lma_block_ref(z, params):
    (ln1_w, ln1_b, attn_w, attn_b, proj_w, proj_b,
     ln2_w, ln2_b, fc_w, fc_b, fc2_w, fc2_b) = params

    def ln(x, w, b):
        mean = jnp.mean(x, axis=-1, keepdims=True)
        var = jnp.mean((x - mean) ** 2, axis=-1, keepdims=True)
        return (x - mean) / jnp.sqrt(var + LN_EPS) * w + b

    x = ln(z, ln1_w, ln1_b)
    qkv = x @ attn_w + attn_b                         # (B, L, 3D)
    q, k, v = jnp.split(qkv, 3, axis=-1)

    def split_heads(t):
        return t.reshape(B, L_NEW, N_HEADS, HEAD_DIM).transpose(0, 2, 1, 3)

    q, k, v = split_heads(q), split_heads(k), split_heads(v)
    s = jnp.einsum('bhld,bhmd->bhlm', q, k) / math.sqrt(HEAD_DIM)
    p = jax.nn.softmax(s, axis=-1)
    y = jnp.einsum('bhlm,bhmd->bhld', p, v)
    y = y.transpose(0, 2, 1, 3).reshape(B, L_NEW, D_NEW)
    y = y @ proj_w + proj_b
    z1 = z + y

    x2 = ln(z1, ln2_w, ln2_b)
    h = x2 @ fc_w + fc_b
    h = 0.5 * h * (1.0 + lax.erf(h / math.sqrt(2.0)))
    h = h @ fc2_w + fc2_b
    return z1 + h


# ----------------------------- parameter init ------------------------------
def init_params(key):
    ks = jax.random.split(key, 8)
    scale = 0.02
    ln1_w = jnp.ones((1, D_NEW), jnp.float32)
    ln1_b = jnp.zeros((1, D_NEW), jnp.float32)
    attn_w = scale * jax.random.normal(ks[0], (D_NEW, 3 * D_NEW), jnp.float32)
    attn_b = scale * jax.random.normal(ks[1], (1, 3 * D_NEW), jnp.float32)
    proj_w = scale * jax.random.normal(ks[2], (D_NEW, D_NEW), jnp.float32)
    proj_b = scale * jax.random.normal(ks[3], (1, D_NEW), jnp.float32)
    ln2_w = jnp.ones((1, D_NEW), jnp.float32)
    ln2_b = jnp.zeros((1, D_NEW), jnp.float32)
    fc_w = scale * jax.random.normal(ks[4], (D_NEW, FF_HIDDEN), jnp.float32)
    fc_b = scale * jax.random.normal(ks[5], (1, FF_HIDDEN), jnp.float32)
    fc2_w = scale * jax.random.normal(ks[6], (FF_HIDDEN, D_NEW), jnp.float32)
    fc2_b = scale * jax.random.normal(ks[7], (1, D_NEW), jnp.float32)
    return (ln1_w, ln1_b, attn_w, attn_b, proj_w, proj_b,
            ln2_w, ln2_b, fc_w, fc_b, fc2_w, fc2_b)


if __name__ == "__main__":
    key = jax.random.PRNGKey(0)
    k_z, k_p = jax.random.split(key)
    z = jax.random.normal(k_z, (B, L_NEW, D_NEW), jnp.float32)
    params = init_params(k_p)

    # Reference first (the kernel aliases/donates the z buffer).
    ref = jax.block_until_ready(lma_block_ref(z, params))

    param_slab = jax.block_until_ready(pack_params(params))  # one-time weight prep
    out = lma_block_pallas(z, param_slab)
    out = jax.block_until_ready(out)

    assert out.shape == (B, L_NEW, D_NEW)
    assert jnp.allclose(out, ref, rtol=1e-4, atol=1e-4), "mismatch vs reference"

    print("KERNEL_OK")
</pallas_src>

<mosaic_0001>
module attributes {stable_mosaic.version = 11 : i64} {
  func.func @lma_block_kernel(%arg0: i32, %arg1: memref<16x32xf32, #tpu.memory_space<vmem>>, %arg2: memref<136x192xf32, #tpu.memory_space<vmem>>, %arg3: memref<16x32xf32, #tpu.memory_space<vmem>>) attributes {dimension_semantics = [#tpu.dimension_semantics<arbitrary>], iteration_bounds = array<i64: 1>, scalar_prefetch = 0 : i64, scratch_operands = 0 : i64, tpu.core_type = #tpu.core_type<tc>, window_params = [{pipeline_mode = #tpu.pipeline_mode<synchronous>, transform_indices = @transform_0, window_bounds = array<i64: 16, 32>}, {pipeline_mode = #tpu.pipeline_mode<synchronous>, transform_indices = @transform_1, window_bounds = array<i64: 136, 192>}, {pipeline_mode = #tpu.pipeline_mode<synchronous>, transform_indices = @transform_2, window_bounds = array<i64: 16, 32>}]} {
    %c0 = arith.constant 0 : index
    %c0_0 = arith.constant 0 : index
    %0 = vector.load %arg1[%c0, %c0_0] : memref<16x32xf32, #tpu.memory_space<vmem>>, vector<16x32xf32>
    %c128 = arith.constant 128 : index
    %c0_1 = arith.constant 0 : index
    %1 = vector.load %arg2[%c128, %c0_1] : memref<136x192xf32, #tpu.memory_space<vmem>>, vector<8x192xf32>
    %2 = vector.extract_strided_slice %1 {offsets = [0, 0], sizes = [1, 192], strides = [1, 1]} : vector<8x192xf32> to vector<1x192xf32>
    %3 = vector.extract_strided_slice %1 {offsets = [1, 0], sizes = [1, 32], strides = [1, 1]} : vector<8x192xf32> to vector<1x32xf32>
    %4 = vector.extract_strided_slice %1 {offsets = [2, 0], sizes = [1, 32], strides = [1, 1]} : vector<8x192xf32> to vector<1x32xf32>
    %5 = vector.extract_strided_slice %1 {offsets = [3, 0], sizes = [1, 32], strides = [1, 1]} : vector<8x192xf32> to vector<1x32xf32>
    %6 = vector.extract_strided_slice %1 {offsets = [4, 0], sizes = [1, 32], strides = [1, 1]} : vector<8x192xf32> to vector<1x32xf32>
    %7 = vector.extract_strided_slice %1 {offsets = [5, 0], sizes = [1, 32], strides = [1, 1]} : vector<8x192xf32> to vector<1x32xf32>
    %8 = vector.extract_strided_slice %1 {offsets = [6, 0], sizes = [1, 64], strides = [1, 1]} : vector<8x192xf32> to vector<1x64xf32>
    %9 = vector.extract_strided_slice %1 {offsets = [7, 0], sizes = [1, 32], strides = [1, 1]} : vector<8x192xf32> to vector<1x32xf32>
    %cst = arith.constant dense<0.000000e+00> : vector<16xf32>
    %10 = vector.multi_reduction <add>, %0, %cst [1] : vector<16x32xf32> to vector<16xf32>
    %11 = vector.shape_cast %10 : vector<16xf32> to vector<16x1xf32>
    %cst_2 = arith.constant 3.200000e+01 : f32
    %12 = vector.broadcast %cst_2 : f32 to vector<16x1xf32>
    %13 = arith.divf %11, %12 : vector<16x1xf32>
    %14 = vector.broadcast %13 : vector<16x1xf32> to vector<16x32xf32>
    %15 = arith.subf %0, %14 : vector<16x32xf32>
    %16 = arith.mulf %15, %15 : vector<16x32xf32>
    %cst_3 = arith.constant dense<0.000000e+00> : vector<16xf32>
    %17 = vector.multi_reduction <add>, %16, %cst_3 [1] : vector<16x32xf32> to vector<16xf32>
    %18 = vector.shape_cast %17 : vector<16xf32> to vector<16x1xf32>
    %cst_4 = arith.constant 3.200000e+01 : f32
    %19 = vector.broadcast %cst_4 : f32 to vector<16x1xf32>
    %20 = arith.divf %18, %19 : vector<16x1xf32>
    %cst_5 = arith.constant 9.99999974E-6 : f32
    %21 = vector.broadcast %cst_5 : f32 to vector<16x1xf32>
    %22 = arith.addf %20, %21 : vector<16x1xf32>
    %23 = math.rsqrt %22 : vector<16x1xf32>
    %24 = vector.broadcast %23 : vector<16x1xf32> to vector<16x32xf32>
    %25 = arith.mulf %15, %24 : vector<16x32xf32>
    %26 = vector.broadcast %3 : vector<1x32xf32> to vector<16x32xf32>
    %27 = arith.mulf %25, %26 : vector<16x32xf32>
    %28 = vector.broadcast %4 : vector<1x32xf32> to vector<16x32xf32>
    %29 = arith.addf %27, %28 : vector<16x32xf32>
    %c0_6 = arith.constant 0 : index
    %c0_7 = arith.constant 0 : index
    %30 = vector.load %arg2[%c0_6, %c0_7] : memref<136x192xf32, #tpu.memory_space<vmem>>, vector<32x192xf32>
    %cst_8 = arith.constant dense<0.000000e+00> : vector<16x192xf32>
    %31 = tpu.matmul %29, %30, %cst_8 {dimension_numbers = #tpu.dot_dimension_numbers<[1], [0], [0], [1], [0, 0, 1, 1], [], []>} : vector<16x32xf32>, vector<32x192xf32>, vector<16x192xf32> -> vector<16x192xf32>
    %32 = vector.broadcast %2 : vector<1x192xf32> to vector<16x192xf32>
    %33 = arith.addf %31, %32 : vector<16x192xf32>
    %34 = tpu.iota {dimensions = array<i32: 0>} : vector<16x16xi32>
    %35 = tpu.iota {dimensions = array<i32: 1>} : vector<16x16xi32>
    %36 = arith.xori %34, %35 : vector<16x16xi32>
    %c8_i32 = arith.constant 8 : i32
    %37 = vector.broadcast %c8_i32 : i32 to vector<16x16xi32>
    %38 = arith.cmpi slt, %36, %37 : vector<16x16xi32>
    %39 = vector.extract_strided_slice %33 {offsets = [0, 0], sizes = [16, 8], strides = [1, 1]} : vector<16x192xf32> to vector<16x8xf32>
    %40 = vector.extract_strided_slice %33 {offsets = [0, 32], sizes = [16, 8], strides = [1, 1]} : vector<16x192xf32> to vector<16x8xf32>
    %cst_9 = arith.constant dense<0.000000e+00> : vector<16x16xf32>
    %41 = tpu.matmul %39, %40, %cst_9 {dimension_numbers = #tpu.dot_dimension_numbers<[1], [1], [0], [0], [0, 0, 1, 0], [], []>} : vector<16x8xf32>, vector<16x8xf32>, vector<16x16xf32> -> vector<16x16xf32>
    %42 = vector.extract_strided_slice %33 {offsets = [0, 8], sizes = [16, 8], strides = [1, 1]} : vector<16x192xf32> to vector<16x8xf32>
    %43 = vector.extract_strided_slice %33 {offsets = [0, 40], sizes = [16, 8], strides = [1, 1]} : vector<16x192xf32> to vector<16x8xf32>
    %cst_10 = arith.constant dense<0.000000e+00> : vector<16x16xf32>
    %44 = tpu.matmul %42, %43, %cst_10 {dimension_numbers = #tpu.dot_dimension_numbers<[1], [1], [0], [0], [0, 0, 1, 0], [], []>} : vector<16x8xf32>, vector<16x8xf32>, vector<16x16xf32> -> vector<16x16xf32>
    %45 = vector.extract_strided_slice %33 {offsets = [0, 16], sizes = [16, 8], strides = [1, 1]} : vector<16x192xf32> to vector<16x8xf32>
    %46 = vector.extract_strided_slice %33 {offsets = [0, 48], sizes = [16, 8], strides = [1, 1]} : vector<16x192xf32> to vector<16x8xf32>
    %cst_11 = arith.constant dense<0.000000e+00> : vector<16x16xf32>
    %47 = tpu.matmul %45, %46, %cst_11 {dimension_numbers = #tpu.dot_dimension_numbers<[1], [1], [0], [0], [0, 0, 1, 0], [], []>} : vector<16x8xf32>, vector<16x8xf32>, vector<16x16xf32> -> vector<16x16xf32>
    %48 = vector.extract_strided_slice %33 {offsets = [0, 24], sizes = [16, 8], strides = [1, 1]} : vector<16x192xf32> to vector<16x8xf32>
    %49 = vector.extract_strided_slice %33 {offsets = [0, 56], sizes = [16, 8], strides = [1, 1]} : vector<16x192xf32> to vector<16x8xf32>
    %cst_12 = arith.constant dense<0.000000e+00> : vector<16x16xf32>
    %50 = tpu.matmul %48, %49, %cst_12 {dimension_numbers = #tpu.dot_dimension_numbers<[1], [1], [0], [0], [0, 0, 1, 0], [], []>} : vector<16x8xf32>, vector<16x8xf32>, vector<16x16xf32> -> vector<16x16xf32>
    %cst_13 = arith.constant dense<0xFF800000> : vector<16xf32>
    %51 = vector.multi_reduction <maximumf>, %41, %cst_13 [1] : vector<16x16xf32> to vector<16xf32>
    %52 = vector.shape_cast %51 : vector<16xf32> to vector<16x1xf32>
    %53 = vector.broadcast %52 : vector<16x1xf32> to vector<16x16xf32>
    %54 = arith.subf %41, %53 : vector<16x16xf32>
    %55 = math.exp %54 : vector<16x16xf32>
    %cst_14 = arith.constant 0.000000e+00 : f32
    %56 = vector.broadcast %cst_14 : f32 to vector<16x16xf32>
    %57 = arith.select %38, %55, %56 : vector<16x16xi1>, vector<16x16xf32>
    %cst_15 = arith.constant dense<0.000000e+00> : vector<16xf32>
    %58 = vector.multi_reduction <add>, %57, %cst_15 [1] : vector<16x16xf32> to vector<16xf32>
    %59 = vector.shape_cast %58 : vector<16xf32> to vector<16x1xf32>
    %60 = tpu.reciprocal %59 {approx = true} : vector<16x1xf32> -> vector<16x1xf32>
    %61 = vector.broadcast %60 : vector<16x1xf32> to vector<16x16xf32>
    %62 = arith.mulf %57, %61 : vector<16x16xf32>
    %cst_16 = arith.constant dense<0xFF800000> : vector<16xf32>
    %63 = vector.multi_reduction <maximumf>, %44, %cst_16 [1] : vector<16x16xf32> to vector<16xf32>
    %64 = vector.shape_cast %63 : vector<16xf32> to vector<16x1xf32>
    %65 = vector.broadcast %64 : vector<16x1xf32> to vector<16x16xf32>
    %66 = arith.subf %44, %65 : vector<16x16xf32>
    %67 = math.exp %66 : vector<16x16xf32>
    %cst_17 = arith.constant 0.000000e+00 : f32
    %68 = vector.broadcast %cst_17 : f32 to vector<16x16xf32>
    %69 = arith.select %38, %67, %68 : vector<16x16xi1>, vector<16x16xf32>
    %cst_18 = arith.constant dense<0.000000e+00> : vector<16xf32>
    %70 = vector.multi_reduction <add>, %69, %cst_18 [1] : vector<16x16xf32> to vector<16xf32>
    %71 = vector.shape_cast %70 : vector<16xf32> to vector<16x1xf32>
    %72 = tpu.reciprocal %71 {approx = true} : vector<16x1xf32> -> vector<16x1xf32>
    %73 = vector.broadcast %72 : vector<16x1xf32> to vector<16x16xf32>
    %74 = arith.mulf %69, %73 : vector<16x16xf32>
    %cst_19 = arith.constant dense<0xFF800000> : vector<16xf32>
    %75 = vector.multi_reduction <maximumf>, %47, %cst_19 [1] : vector<16x16xf32> to vector<16xf32>
    %76 = vector.shape_cast %75 : vector<16xf32> to vector<16x1xf32>
    %77 = vector.broadcast %76 : vector<16x1xf32> to vector<16x16xf32>
    %78 = arith.subf %47, %77 : vector<16x16xf32>
    %79 = math.exp %78 : vector<16x16xf32>
    %cst_20 = arith.constant 0.000000e+00 : f32
    %80 = vector.broadcast %cst_20 : f32 to vector<16x16xf32>
    %81 = arith.select %38, %79, %80 : vector<16x16xi1>, vector<16x16xf32>
    %cst_21 = arith.constant dense<0.000000e+00> : vector<16xf32>
    %82 = vector.multi_reduction <add>, %81, %cst_21 [1] : vector<16x16xf32> to vector<16xf32>
    %83 = vector.shape_cast %82 : vector<16xf32> to vector<16x1xf32>
    %84 = tpu.reciprocal %83 {approx = true} : vector<16x1xf32> -> vector<16x1xf32>
    %85 = vector.broadcast %84 : vector<16x1xf32> to vector<16x16xf32>
    %86 = arith.mulf %81, %85 : vector<16x16xf32>
    %cst_22 = arith.constant dense<0xFF800000> : vector<16xf32>
    %87 = vector.multi_reduction <maximumf>, %50, %cst_22 [1] : vector<16x16xf32> to vector<16xf32>
    %88 = vector.shape_cast %87 : vector<16xf32> to vector<16x1xf32>
    %89 = vector.broadcast %88 : vector<16x1xf32> to vector<16x16xf32>
    %90 = arith.subf %50, %89 : vector<16x16xf32>
    %91 = math.exp %90 : vector<16x16xf32>
    %cst_23 = arith.constant 0.000000e+00 : f32
    %92 = vector.broadcast %cst_23 : f32 to vector<16x16xf32>
    %93 = arith.select %38, %91, %92 : vector<16x16xi1>, vector<16x16xf32>
    %cst_24 = arith.constant dense<0.000000e+00> : vector<16xf32>
    %94 = vector.multi_reduction <add>, %93, %cst_24 [1] : vector<16x16xf32> to vector<16xf32>
    %95 = vector.shape_cast %94 : vector<16xf32> to vector<16x1xf32>
    %96 = tpu.reciprocal %95 {approx = true} : vector<16x1xf32> -> vector<16x1xf32>
    %97 = vector.broadcast %96 : vector<16x1xf32> to vector<16x16xf32>
    %98 = arith.mulf %93, %97 : vector<16x16xf32>
    %99 = vector.extract_strided_slice %33 {offsets = [0, 64], sizes = [16, 32], strides = [1, 1]} : vector<16x192xf32> to vector<16x32xf32>
    %cst_25 = arith.constant dense<0.000000e+00> : vector<16x32xf32>
    %100 = tpu.matmul %62, %99, %cst_25 {dimension_numbers = #tpu.dot_dimension_numbers<[1], [0], [0], [1], [0, 0, 1, 1], [], []>} : vector<16x16xf32>, vector<16x32xf32>, vector<16x32xf32> -> vector<16x32xf32>
    %101 = vector.extract_strided_slice %33 {offsets = [0, 96], sizes = [16, 32], strides = [1, 1]} : vector<16x192xf32> to vector<16x32xf32>
    %cst_26 = arith.constant dense<0.000000e+00> : vector<16x32xf32>
    %102 = tpu.matmul %74, %101, %cst_26 {dimension_numbers = #tpu.dot_dimension_numbers<[1], [0], [0], [1], [0, 0, 1, 1], [], []>} : vector<16x16xf32>, vector<16x32xf32>, vector<16x32xf32> -> vector<16x32xf32>
    %103 = arith.addf %100, %102 : vector<16x32xf32>
    %104 = vector.extract_strided_slice %33 {offsets = [0, 128], sizes = [16, 32], strides = [1, 1]} : vector<16x192xf32> to vector<16x32xf32>
    %cst_27 = arith.constant dense<0.000000e+00> : vector<16x32xf32>
    %105 = tpu.matmul %86, %104, %cst_27 {dimension_numbers = #tpu.dot_dimension_numbers<[1], [0], [0], [1], [0, 0, 1, 1], [], []>} : vector<16x16xf32>, vector<16x32xf32>, vector<16x32xf32> -> vector<16x32xf32>
    %106 = arith.addf %103, %105 : vector<16x32xf32>
    %107 = vector.extract_strided_slice %33 {offsets = [0, 160], sizes = [16, 32], strides = [1, 1]} : vector<16x192xf32> to vector<16x32xf32>
    %cst_28 = arith.constant dense<0.000000e+00> : vector<16x32xf32>
    %108 = tpu.matmul %98, %107, %cst_28 {dimension_numbers = #tpu.dot_dimension_numbers<[1], [0], [0], [1], [0, 0, 1, 1], [], []>} : vector<16x16xf32>, vector<16x32xf32>, vector<16x32xf32> -> vector<16x32xf32>
    %109 = arith.addf %106, %108 : vector<16x32xf32>
    %110 = arith.addf %0, %109 : vector<16x32xf32>
    %111 = vector.broadcast %7 : vector<1x32xf32> to vector<16x32xf32>
    %112 = arith.addf %110, %111 : vector<16x32xf32>
    %cst_29 = arith.constant dense<0.000000e+00> : vector<16xf32>
    %113 = vector.multi_reduction <add>, %112, %cst_29 [1] : vector<16x32xf32> to vector<16xf32>
    %114 = vector.shape_cast %113 : vector<16xf32> to vector<16x1xf32>
    %cst_30 = arith.constant 3.200000e+01 : f32
    %115 = vector.broadcast %cst_30 : f32 to vector<16x1xf32>
    %116 = arith.divf %114, %115 : vector<16x1xf32>
    %117 = vector.broadcast %116 : vector<16x1xf32> to vector<16x32xf32>
    %118 = arith.subf %112, %117 : vector<16x32xf32>
    %119 = arith.mulf %118, %118 : vector<16x32xf32>
    %cst_31 = arith.constant dense<0.000000e+00> : vector<16xf32>
    %120 = vector.multi_reduction <add>, %119, %cst_31 [1] : vector<16x32xf32> to vector<16xf32>
    %121 = vector.shape_cast %120 : vector<16xf32> to vector<16x1xf32>
    %cst_32 = arith.constant 3.200000e+01 : f32
    %122 = vector.broadcast %cst_32 : f32 to vector<16x1xf32>
    %123 = arith.divf %121, %122 : vector<16x1xf32>
    %cst_33 = arith.constant 9.99999974E-6 : f32
    %124 = vector.broadcast %cst_33 : f32 to vector<16x1xf32>
    %125 = arith.addf %123, %124 : vector<16x1xf32>
    %126 = math.rsqrt %125 : vector<16x1xf32>
    %127 = vector.broadcast %126 : vector<16x1xf32> to vector<16x32xf32>
    %128 = arith.mulf %118, %127 : vector<16x32xf32>
    %129 = vector.broadcast %5 : vector<1x32xf32> to vector<16x32xf32>
    %130 = arith.mulf %128, %129 : vector<16x32xf32>
    %131 = vector.broadcast %6 : vector<1x32xf32> to vector<16x32xf32>
    %132 = arith.addf %130, %131 : vector<16x32xf32>
    %c32 = arith.constant 32 : index
    %c0_34 = arith.constant 0 : index
    %133 = vector.load %arg2[%c32, %c0_34] : memref<136x192xf32, #tpu.memory_space<vmem>>, vector<32x64xf32>
    %cst_35 = arith.constant dense<0.000000e+00> : vector<16x64xf32>
    %134 = tpu.matmul %132, %133, %cst_35 {dimension_numbers = #tpu.dot_dimension_numbers<[1], [0], [0], [1], [0, 0, 1, 1], [], []>} : vector<16x32xf32>, vector<32x64xf32>, vector<16x64xf32> -> vector<16x64xf32>
    %135 = vector.broadcast %8 : vector<1x64xf32> to vector<16x64xf32>
    %136 = arith.addf %134, %135 : vector<16x64xf32>
    %cst_36 = arith.constant 5.000000e-01 : f32
    %137 = vector.broadcast %cst_36 : f32 to vector<16x64xf32>
    %138 = arith.mulf %137, %136 : vector<16x64xf32>
    %cst_37 = arith.constant 0.707106769 : f32
    %139 = vector.broadcast %cst_37 : f32 to vector<16x64xf32>
    %140 = arith.mulf %136, %139 : vector<16x64xf32>
    %141 = math.erf %140 : vector<16x64xf32>
    %cst_38 = arith.constant 1.000000e+00 : f32
    %142 = vector.broadcast %cst_38 : f32 to vector<16x64xf32>
    %143 = arith.addf %142, %141 : vector<16x64xf32>
    %144 = arith.mulf %138, %143 : vector<16x64xf32>
    %c64 = arith.constant 64 : index
    %c0_39 = arith.constant 0 : index
    %145 = vector.load %arg2[%c64, %c0_39] : memref<136x192xf32, #tpu.memory_space<vmem>>, vector<64x32xf32>
    %cst_40 = arith.constant dense<0.000000e+00> : vector<16x32xf32>
    %146 = tpu.matmul %144, %145, %cst_40 {dimension_numbers = #tpu.dot_dimension_numbers<[1], [0], [0], [1], [0, 0, 1, 1], [], []>} : vector<16x64xf32>, vector<64x32xf32>, vector<16x32xf32> -> vector<16x32xf32>
    %147 = vector.broadcast %9 : vector<1x32xf32> to vector<16x32xf32>
    %148 = arith.addf %146, %147 : vector<16x32xf32>
    %149 = arith.addf %112, %148 : vector<16x32xf32>
    %c0_41 = arith.constant 0 : index
    %c0_42 = arith.constant 0 : index
    %150 = vector.load %arg3[%c0_41, %c0_42] : memref<16x32xf32, #tpu.memory_space<vmem>>, vector<16x32xf32>
    tpu.vector_store %arg3[%c0_41, %c0_42], %149 {strides = array<i32>} : memref<16x32xf32, #tpu.memory_space<vmem>>, vector<16x32xf32>,
    return
  }
  func.func @transform_0(%arg0: i32) -> (i32, i32) {
    %c0_i32 = arith.constant 0 : i32
    %c0_i32_0 = arith.constant 0 : i32
    %c0_i32_1 = arith.constant 0 : i32
    return %c0_i32, %c0_i32_0 : i32, i32
  }
  func.func @transform_1(%arg0: i32) -> (i32, i32) {
    %c0_i32 = arith.constant 0 : i32
    %c0_i32_0 = arith.constant 0 : i32
    %c0_i32_1 = arith.constant 0 : i32
    return %c0_i32, %c0_i32_0 : i32, i32
  }
  func.func @transform_2(%arg0: i32) -> (i32, i32) {
    %c0_i32 = arith.constant 0 : i32
    %c0_i32_0 = arith.constant 0 : i32
    %c0_i32_1 = arith.constant 0 : i32
    return %c0_i32, %c0_i32_0 : i32, i32
  }
}

</mosaic_0001>

<bundles_post_ra>
// kernel: tpu_custom_call.1
= control target key start
LH: loop header
LB: loop body
LE: loop exit
PB: predicated region body
PF: predicated region fallthrough
CT: control target
= control target key end

     0   :  { %7 = vsyncpa [#allocation3], 0  ;;  %s1767_s0 = inlined_call_operand.hbm [shape: f32[16,32], index: 0, kind: input, shape index: {}, may-alias: {0,2}]   ;;  %s1768_s1 = inlined_call_operand.hbm [shape: f32[136,192], index: 1, kind: input, shape index: {}]   ;;  %s1769_s2 = inlined_call_operand.hbm [shape: f32[16,32], index: 2, kind: output, shape index: {}, may-alias: {0,2}]  }
   0x1   :  { %8 = vsyncpa [#allocation6], 0 }
   0x2   :  { %9 = vsyncpa [#allocation4], 0  ;;  %s1552_s9 = smov [#allocation2]  }
   0x3   :  { %s15_s10 = sshll.u32 %s1552_s9, 4  ;;  %s16_s10 = int_to_ptr.vmem [resolvable:$true] %s15_s10 }
   0x4   :  { %s1494_s11 = scalar_lea.vmem %s16_s10, 256  ;;  %p1499_p1 = scmp.lt.s32.totalorder %s16_s10, %s16_s10 }
   0x5   :  { %p1495_p0 = scmp.ne.s32.totalorder %s16_s10, %s1494_s11  ;;  %p1500_p2 = scmp.lt.s32.totalorder %s1494_s11, %s1494_s11 }
   0x7   :  { %p1501_p3 = por %p1500_p2, %p1499_p1 }
   0x9   :  { %p1502_p4 = pnand %p1501_p3, %p1495_p0 }
   0xb   :  { %1505 = shalt.err (!%p1502_p4)
}
   0xc   :  { %s1553_s12 = smov 128   ;;  %s1554_s13 = smov 8  }
   0xd   :  { %21 = dma.hbm_to_vmem [thread:$0]  %s1767_s0, 256, %s16_s10, [#allocation3], %s1553_s12, %s1553_s12, %s1554_s13  }
   0xe   :  { %s1555_s16 = smov [#allocation5]  }
   0xf   :  { %s27_s17 = sshll.u32 %s1555_s16, 4  ;;  %s28_s17 = int_to_ptr.vmem [resolvable:$true] %s27_s17 }
  0x10   :  { %s1514_s18 = scalar_lea.vmem %s28_s17, 4352  ;;  %p1519_p6 = scmp.lt.s32.totalorder %s28_s17, %s28_s17 }
  0x11   :  { %p1515_p5 = scmp.ne.s32.totalorder %s28_s17, %s1514_s18  ;;  %p1520_p7 = scmp.lt.s32.totalorder %s1514_s18, %s1514_s18 }
  0x13   :  { %p1521_p8 = por %p1520_p7, %p1519_p6 }
  0x15   :  { %p1522_p9 = pnand %p1521_p8, %p1515_p5 }
  0x17   :  { %1525 = shalt.err (!%p1522_p9)
}
  0x18   :  { %s1556_s19 = smov 256   ;;  %s1557_s20 = smov 16  }
  0x19   :  { %33 = dma.hbm_to_vmem [thread:$0]  %s1768_s1, 4352, %s28_s17, [#allocation6], %s1556_s19, %s1556_s19, %s1557_s20  }
  0x1a   :  { %1546 = dma.done.wait [#allocation3], 256  }
  0x1b   :  { %1547 = vsyncadd [#allocation3], 4294967040 }
  0x1c   :  { %1548 = dma.done.wait [#allocation6], 4352  }
  0x1d   :  { %1549 = vsyncadd [#allocation6], 4294962944  ;;  %vm44_vm0 = vcmask 261120   ;;  %v1593_v0 = vld [vmem:[#allocation2] sm:$0xff]  ;;  %v1595_v1 = vld [vmem:[#allocation2 + $0x8] sm:$0xff]  ;;  %v1558_v18 = vmov 0.0   ;;  %v72_v28 = vlaneseq }
  0x1e   :  { %v45_v2 = vsel %vm44_vm0, %v1593_v0, 0.0  ;;  %v48_v3 = vsel %vm44_vm0, %v1595_v1, 0.0  ;;  %v91_v14 = vld [vmem:[#allocation5 + $0x38] sm:$0xff]  ;;  %v90_v15 = vld [vmem:[#allocation5 + $0x30] sm:$0xff]  ;;  %v89_v16 = vld [vmem:[#allocation5 + $0x28] sm:$0xff]  ;;  %170 = vmatprep.mubr.f32.mxu0 %v1558_v18  ;;  %vm198_vm1 = vcmask 64512  }
  0x1f   :  { %46 = vadd.xlane.f32.xlu0 %v45_v2  ;;  %130 = vmatprep.subr.mxu0 %v91_v14  ;;  %v88_v17 = vld [vmem:[#allocation5 + $0x20] sm:$0xff]  ;;  %v87_v19 = vld [vmem:[#allocation5 + $0x18] sm:$0xff]  ;;  %v86_v20 = vld [vmem:[#allocation5 + $0x10] sm:$0xff]  ;;  %v1606_v30 = vshrl.u32 %v72_v28, 7  ;;  %s1559_s0 = smov 96   ;;  %s1560_s1 = smov 88  }
  0x20   :  { %131 = vmatpush1.msra.mxu0 %v90_v15  ;;  %v85_v21 = vld [vmem:[#allocation5 + $0x8] sm:$0xff]  ;;  %v84_v22 = vld [vmem:[#allocation5] sm:$0xff]  ;;  %s1561_s23 = smov 120   ;;  %s1562_s24 = smov 80   ;;  %vm555_vm2 = vcmask 130048   ;;  %vm1157_vm5 = vcmask 523264  }
  0x21   :  { %132 = vmatprep.subr.mxu0 %v89_v16  ;;  %v74_v31 = vsub.s32 1, %v1606_v30  ;;  %v1609_v32 = vld [vmem:[#allocation5 + $0x100] sm:$0xff]  ;;  %v80_v33 = vsub.s32 2, %v1606_v30  ;;  %v94_v44 = vsub.s32 0, %v1606_v30  ;;  %s1563_s25 = smov 72   ;;  %s1564_s26 = smov 112  }
  0x22   :  { %133 = vmatpush1.msra.mxu0 %v88_v17  ;;  %s1565_s27 = smov 104   ;;  %s1566_s28 = smov 32  }
  0x23   :  { %49 = vadd.xlane.f32.xlu0 %v48_v3  ;;  %134 = vmatprep.subr.mxu0 %v87_v19  ;;  %v75_v34 = vrot.slane %v1609_v32, %v74_v31  ;;  %v81_v37 = vrot.slane %v1609_v32, %v80_v33  ;;  %v95_v45 = vrot.slane %v1609_v32, %v94_v44  ;;  %s1567_s29 = smov 64   ;;  %s1568_s30 = smov [#allocation7]  }
  0x24   :  { %135 = vmatpush1.msra.mxu0 %v86_v20  ;;  %s1248_s3 = sshll.u32 %s1568_s30, 4  ;;  %s1249_s3 = int_to_ptr.vmem [resolvable:$true] %s1248_s3 }
  0x25   :  { %136 = vmatprep.subr.mxu0 %v85_v21  ;;  %s1526_s4 = scalar_lea.vmem %s1249_s3, 256  ;;  %p1531_p11 = scmp.lt.s32.totalorder %s1249_s3, %s1249_s3 }
  0x26   :  { %137 = vmatpush1.msra.mxu0 %v84_v22  ;;  %p1527_p10 = scmp.ne.s32.totalorder %s1249_s3, %s1526_s4  ;;  %p1532_p12 = scmp.lt.s32.totalorder %s1526_s4, %s1526_s4 }
  0x28   :  { %p1533_p13 = por %p1532_p12, %p1531_p11 }
  0x2a   :  { %p1534_p0 = pnand %p1533_p13, %p1527_p10 }
  0xa8   :  { %v47_v4 = vpop.xlane.xlu0 %46 }
  0xa9   :  { %v52_v5 = vmul.f32 0.03125, %v47_v4 }
  0xab   :  { %v54_v6 = vsub.f32 %v1593_v0, %v52_v5 }
  0xac   :  { %v50_v7 = vpop.xlane.xlu0 %49 }
  0xad   :  { %v53_v8 = vmul.f32 0.03125, %v50_v7  ;;  %v56_v9 = vmul.f32 %v54_v6, %v54_v6 }
  0xaf   :  { %v55_v10 = vsub.f32 %v1595_v1, %v53_v8  ;;  %v58_v11 = vsel %vm44_vm0, %v56_v9, 0.0 }
  0xb0   :  { %59 = vadd.xlane.f32.xlu1 %v58_v11 }
  0xb1   :  { %v57_v12 = vmul.f32 %v55_v10, %v55_v10 }
  0xb3   :  { %v61_v13 = vsel %vm44_vm0, %v57_v12, 0.0 }
  0xb4   :  { %62 = vadd.xlane.f32.xlu1 %v61_v13 }
 0x139   :  { %v60_v23 = vpop.xlane.xlu1 %59 }
 0x13a   :  { %v64_v24 = vmul.f32 0.03125, %v60_v23 }
 0x13c   :  { %v66_v25 = vadd.f32 1e-05, %v64_v24 }
 0x13d   :  { %v63_v26 = vpop.xlane.xlu1 %62 }
 0x13e   :  { %1442 = vrsqrt.f32 %v66_v25  ;;  %v65_v27 = vmul.f32 0.03125, %v63_v26 }
 0x140   :  { %v67_v29 = vadd.f32 1e-05, %v65_v27 }
 0x142   :  { %1444 = vrsqrt.f32 %v67_v29 }
 0x14b   :  { %v1443_v35 = vpop.eup %1442 }
 0x14c   :  { %v70_v36 = vmul.f32 %v1443_v35, %v54_v6 }
 0x14e   :  { %v76_v38 = vmul.f32 %v75_v34, %v70_v36 }
 0x14f   :  { %v1445_v39 = vpop.eup %1444 }
 0x150   :  { %v82_v40 = vadd.f32 %v81_v37, %v76_v38  ;;  %v71_v41 = vmul.f32 %v1445_v39, %v55_v10 }
 0x152   :  { %1261 = vmatmul.mubr.msk.f32.vlgmr.msra.gmra.mxu0 %vm44_vm0, %v82_v40  ;;  %v77_v42 = vmul.f32 %v75_v34, %v71_v41  ;;  %v185_v41 = vadd.s32 8, %v1606_v30 }
 0x153   :  { %176 = vmatprep.mubr.f32.mxu0 %v1558_v18 }
 0x154   :  { %v83_v43 = vadd.f32 %v81_v37, %v77_v42  ;;  %v187_v42 = vand.u32 127, %v72_v28  ;;  %v1004_v28 = vsub.s32 5, %v1606_v30 }
 0x156   :  { %1262 = vmatmul.mubr.msk.f32.gmra.mxu0 %vm44_vm0, %v83_v43 }
 0x212   :  { %v172_v46 = vpop.f32.mrf.mxu0 }
 0x213   :  { %v1620_v47 = vadd.f32 %v172_v46, %v95_v45 }
 0x214   :  { %v1622_v48 = vpop.f32.mrf.mxu0 }
 0x215   :  { %1343 = vmatprep.mubr.msk.f32.mxu1 %vm198_vm1, %v1620_v47  ;;  %194 = vrot.lane.b32.xlu1 %v1620_v47, %s1559_s0 }
 0x216   :  { %v178_v49 = vpop.f32.mrf.mxu0 }
 0x217   :  { %v1628_v50 = vadd.f32 %v178_v49, %v95_v45 }
 0x218   :  { %v1669_v5 = vpop.f32.mrf.mxu0 }
 0x219   :  { %286 = vrot.lane.b32.xlu1 %v1620_v47, %s1560_s1  ;;  %196 = vrot.lane.b32.xlu0 %v1628_v50, %s1559_s0 }
 0x21d   :  { %282 = vrot.lane.b32.xlu1 %v1620_v47, %s1561_s23  ;;  %377 = vrot.lane.b32.xlu0 %v1620_v47, %s1562_s24 }
 0x221   :  { %288 = vrot.lane.b32.xlu1 %v1628_v50, %s1560_s1  ;;  %379 = vrot.lane.b32.xlu0 %v1628_v50, %s1562_s24 }
 0x225   :  { %468 = vrot.lane.b32.xlu1 %v1620_v47, %s1563_s25  ;;  %470 = vrot.lane.b32.xlu0 %v1628_v50, %s1563_s25 }
 0x229   :  { %284 = vrot.lane.b32.xlu1 %v1628_v50, %s1561_s23  ;;  %373 = vrot.lane.b32.xlu0 %v1620_v47, %s1564_s26 }
 0x22d   :  { %375 = vrot.lane.b32.xlu1 %v1628_v50, %s1564_s26  ;;  %464 = vrot.lane.b32.xlu0 %v1620_v47, %s1565_s27 }
 0x231   :  { %466 = vrot.lane.b32.xlu1 %v1628_v50, %s1565_s27 }
 0x287   :  { %v195_v51 = vpop.permute.xlu1 %194 }
 0x28b   :  { %v197_v52 = vpop.permute.xlu0 %196  ;;  %v287_v53 = vpop.permute.xlu1 %286 }
 0x28c   :  { %1339 = vmatprep.subr.msk.mxu1 %vm198_vm1, %v197_v52 }
 0x28d   :  { %1340 = vmatpush3.xpose.msk.msra.mxu1 %vm198_vm1, %v197_v52 }
 0x28e   :  { %1341 = vmatprep.subr.msk.mxu1 %vm198_vm1, %v195_v51 }
 0x28f   :  { %v378_v54 = vpop.permute.xlu0 %377  ;;  %v283_v55 = vpop.permute.xlu1 %282 }
 0x290   :  { %1350 = vmatprep.mubr.msk.f32.mxu0 %vm198_vm1, %v283_v55  ;;  %v43_v55 = vld [vmem:[#allocation5 + $0x108] sm:$0xff] }
 0x291   :  { %1342 = vmatpush3.xpose.msk.msra.mxu1 %vm198_vm1, %v195_v51  ;;  %v188_v51 = vxor.u32 %v187_v42, %v1606_v30 }
 0x293   :  { %v380_v56 = vpop.permute.xlu0 %379  ;;  %v289_v57 = vpop.permute.xlu1 %288  ;;  %vm1689_vm4 = vcmp.lt.s32.totalorder %v188_v51, 8 }
 0x294   :  { %1344 = vmatmul.mubr.msk.f32.vlgmr.msra.gmra.mxu1 %vm198_vm1, %v1628_v50  ;;  %1346 = vmatprep.subr.msk.mxu0 %vm198_vm1, %v289_v57 }
 0x295   :  { %1353 = vmatprep.subr.msk.mxu1 %vm198_vm1, %v380_v56  ;;  %1347 = vmatpush3.xpose.msk.msra.mxu0 %vm198_vm1, %v289_v57 }
 0x296   :  { %1354 = vmatpush3.xpose.msk.msra.mxu1 %vm198_vm1, %v380_v56  ;;  %1348 = vmatprep.subr.msk.mxu0 %vm198_vm1, %v287_v53 }
 0x297   :  { %1355 = vmatprep.subr.msk.mxu1 %vm198_vm1, %v378_v54  ;;  %v471_v58 = vpop.permute.xlu0 %470  ;;  %v469_v59 = vpop.permute.xlu1 %468 }
 0x299   :  { %1349 = vmatpush3.xpose.msk.msra.mxu0 %vm198_vm1, %v287_v53 }
 0x29a   :  { %1356 = vmatpush3.xpose.msk.msra.mxu1 %vm198_vm1, %v378_v54  ;;  %1360 = vmatprep.subr.msk.mxu0 %vm198_vm1, %v471_v58 }
 0x29b   :  { %v374_v60 = vpop.permute.xlu0 %373  ;;  %v285_v61 = vpop.permute.xlu1 %284 }
 0x29c   :  { %1351 = vmatmul.mubr.msk.f32.vlgmr.msra.gmra.mxu0 %vm198_vm1, %v285_v61  ;;  %1357 = vmatprep.mubr.msk.f32.mxu1 %vm198_vm1, %v374_v60 }
 0x29d   :  { %1361 = vmatpush3.xpose.msk.msra.mxu0 %vm198_vm1, %v471_v58 }
 0x29e   :  { %1362 = vmatprep.subr.msk.mxu0 %vm198_vm1, %v469_v59 }
 0x29f   :  { %v465_v62 = vpop.permute.xlu0 %464  ;;  %v376_v63 = vpop.permute.xlu1 %375 }
 0x2a0   :  { %1358 = vmatmul.mubr.msk.f32.vlgmr.msra.gmra.mxu1 %vm198_vm1, %v376_v63  ;;  %1364 = vmatprep.mubr.msk.f32.mxu0 %vm198_vm1, %v465_v62  ;;  %v99_v62 = vrot.slane %v43_v55, %v94_v44 }
 0x2a1   :  { %1363 = vmatpush3.xpose.msk.msra.mxu0 %vm198_vm1, %v469_v59 }
 0x2a3   :  { %v467_v2 = vpop.permute.xlu1 %466 }
 0x2a4   :  { %1365 = vmatmul.mubr.msk.f32.vlgmr.msra.gmra.mxu0 %vm198_vm1, %v467_v2 }
 0x354   :  { %v1345_v3 = vpop.f32.mrf.mxu1 }
 0x355   :  { %v559_v4 = vsel %vm555_vm2, %v1345_v3, -inf }
 0x356   :  { %560 = vmax.xlane.f32.xlu0 %v559_v4  ;;  %v273_v8 = vpop.f32.mrf.mxu1 }
 0x357   :  { %v556_v13 = vsel %vm555_vm2, %v273_v8, -inf }
 0x35c   :  { %v1352_v6 = vpop.f32.mrf.mxu0 }
 0x35d   :  { %v583_v7 = vsel %vm555_vm2, %v1352_v6, -inf }
 0x35e   :  { %584 = vmax.xlane.f32.xlu1 %v583_v7  ;;  %v364_v9 = vpop.f32.mrf.mxu0  ;;  %v181_v7 = vadd.f32 %v1669_v5, %v99_v62 }
 0x35f   :  { %v580_v10 = vsel %vm555_vm2, %v364_v9, -inf }
 0x360   :  { %581 = vmax.xlane.f32.xlu0 %v580_v10  ;;  %v1359_v11 = vpop.f32.mrf.mxu1 }
 0x361   :  { %v607_v12 = vsel %vm555_vm2, %v1359_v11, -inf }
 0x362   :  { %608 = vmax.xlane.f32.xlu1 %v607_v12  ;;  %v455_v14 = vpop.f32.mrf.mxu1 }
 0x363   :  { %v604_v17 = vsel %vm555_vm2, %v455_v14, -inf }
 0x364   :  { %557 = vmax.xlane.f32.xlu0 %v556_v13  ;;  %v1366_v15 = vpop.f32.mrf.mxu0 }
 0x365   :  { %v631_v16 = vsel %vm555_vm2, %v1366_v15, -inf }
 0x366   :  { %632 = vmax.xlane.f32.xlu1 %v631_v16  ;;  %v546_v18 = vpop.f32.mrf.mxu0 }
 0x367   :  { %v628_v19 = vsel %vm555_vm2, %v546_v18, -inf }
 0x368   :  { %605 = vmax.xlane.f32.xlu0 %v604_v17 }
 0x36c   :  { %629 = vmax.xlane.f32.xlu0 %v628_v19 }
 0x377   :  { %652 = vrot.lane.b32.xlu1 %v1620_v47, %s1566_s28 }
 0x37b   :  { %741 = vrot.lane.b32.xlu1 %v1628_v50, %s1567_s29 }
 0x37f   :  { %739 = vrot.lane.b32.xlu1 %v1620_v47, %s1567_s29 }
 0x382   :  { %654 = vrot.lane.b32.xlu0 %v1628_v50, %s1566_s28  ;;  %v189_v50 = vxor.u32 %v187_v42, %v185_v41 }
 0x384   :  { %vm1685_vm3 = vcmp.lt.s32.totalorder %v189_v50, 8 }
 0x3df   :  { %v561_v20 = vpop.xlane.xlu0 %560 }
 0x3e0   :  { %v563_v21 = vsub.f32 %v1345_v3, %v561_v20 }
 0x3e2   :  { %v566_v22 = vmul.f32 1.442695, %v563_v21 }
 0x3e4   :  { %1446 = vpow2.f32 %v566_v22  ;;  %v175_v22 = vadd.f32 %v1622_v48, %v99_v62 }
 0x3e7   :  { %v585_v23 = vpop.xlane.xlu1 %584 }
 0x3e8   :  { %v587_v24 = vsub.f32 %v1352_v6, %v585_v23 }
 0x3e9   :  { %v582_v25 = vpop.xlane.xlu0 %581 }
 0x3ea   :  { %v590_v26 = vmul.f32 1.442695, %v587_v24  ;;  %v586_v27 = vsub.f32 %v364_v9, %v582_v25 }
 0x3eb   :  { %v609_v29 = vpop.xlane.xlu1 %608 }
 0x3ec   :  { %1448 = vpow2.f32 %v590_v26  ;;  %v588_v31 = vmul.f32 1.442695, %v586_v27  ;;  %v611_v33 = vsub.f32 %v1359_v11, %v609_v29 }
 0x3ed   :  { %v558_v34 = vpop.xlane.xlu0 %557 }
 0x3ee   :  { %1450 = vpow2.f32 %v588_v31  ;;  %v614_v35 = vmul.f32 1.442695, %v611_v33  ;;  %v562_v36 = vsub.f32 %v273_v8, %v558_v34 }
 0x3ef   :  { %v633_v37 = vpop.xlane.xlu1 %632 }
 0x3f0   :  { %1452 = vpow2.f32 %v614_v35  ;;  %v564_v38 = vmul.f32 1.442695, %v562_v36  ;;  %v635_v39 = vsub.f32 %v1366_v15, %v633_v37 }
 0x3f1   :  { %v606_v40 = vpop.xlane.xlu0 %605  ;;  %v1447_v54 = vpop.eup %1446 }
 0x3f2   :  { %1454 = vpow2.f32 %v564_v38  ;;  %v638_v43 = vmul.f32 1.442695, %v635_v39  ;;  %v610_v45 = vsub.f32 %v455_v14, %v606_v40  ;;  %v569_v4 = vsel %vm1685_vm3, %v1447_v54, 0.0 }
 0x3f3   :  { %v653_v46 = vpop.permute.xlu1 %652  ;;  %v573_v9 = vsel %vm555_vm2, %v569_v4, 0.0 }
 0x3f4   :  { %1456 = vpow2.f32 %v638_v43  ;;  %v612_v47 = vmul.f32 1.442695, %v610_v45 }
 0x3f5   :  { %v630_v49 = vpop.xlane.xlu0 %629 }
 0x3f6   :  { %1458 = vpow2.f32 %v612_v47  ;;  %v634_v52 = vsub.f32 %v546_v18, %v630_v49 }
 0x3f7   :  { %v742_v53 = vpop.permute.xlu1 %741 }
 0x3f8   :  { %v636_v56 = vmul.f32 1.442695, %v634_v52  ;;  %1374 = vmatprep.subr.mxu1 %v742_v53 }
 0x3f9   :  { %v1449_v57 = vpop.eup %1448  ;;  %v655_v58 = vpop.permute.xlu0 %654  ;;  %1375 = vmatpush3.msra.mxu1 %v742_v53 }
 0x3fa   :  { %1460 = vpow2.f32 %v636_v56  ;;  %1367 = vmatprep.subr.mxu0 %v655_v58  ;;  %v593_v60 = vsel %vm1685_vm3, %v1449_v57, 0.0 }
 0x3fb   :  { %v1451_v61 = vpop.eup %1450  ;;  %1368 = vmatpush3.msra.mxu0 %v655_v58  ;;  %v740_v63 = vpop.permute.xlu1 %739  ;;  %v597_v2 = vsel %vm555_vm2, %v593_v60, 0.0 }
 0x3fc   :  { %598 = vadd.xlane.f32.xlu1 %v597_v2  ;;  %1369 = vmatprep.subr.mxu0 %v653_v46  ;;  %v592_v3 = vsel %vm1689_vm4, %v1451_v61, 0.0 }
 0x3fd   :  { %v1453_v6 = vpop.eup %1452  ;;  %1376 = vmatprep.subr.mxu1 %v740_v63  ;;  %1370 = vmatpush3.msra.mxu0 %v653_v46  ;;  %v594_v8 = vsel %vm555_vm2, %v592_v3, 0.0 }
 0x3fe   :  { %1377 = vmatpush3.msra.mxu1 %v740_v63  ;;  %595 = vadd.xlane.f32.xlu0 %v594_v8  ;;  %v617_v11 = vsel %vm1685_vm3, %v1453_v6, 0.0 }
 0x3ff   :  { %v1455_v44 = vpop.eup %1454  ;;  %1381 = vmatprep.subr.mxu0 %v181_v7  ;;  %v621_v14 = vsel %vm555_vm2, %v617_v11, 0.0 }
 0x400   :  { %574 = vadd.xlane.f32.xlu1 %v573_v9  ;;  %v568_v10 = vsel %vm1689_vm4, %v1455_v44, 0.0 }
 0x401   :  { %v1457_v12 = vpop.eup %1456  ;;  %v570_v5 = vsel %vm555_vm2, %v568_v10, 0.0 }
 0x402   :  { %571 = vadd.xlane.f32.xlu0 %v570_v5  ;;  %v641_v16 = vsel %vm1685_vm3, %v1457_v12, 0.0 }
 0x403   :  { %v1459_v13 = vpop.eup %1458  ;;  %v645_v19 = vsel %vm555_vm2, %v641_v16, 0.0 }
 0x404   :  { %622 = vadd.xlane.f32.xlu1 %v621_v14  ;;  %v616_v15 = vsel %vm1689_vm4, %v1459_v13, 0.0 }
 0x405   :  { %v618_v17 = vsel %vm555_vm2, %v616_v15, 0.0 }
 0x406   :  { %619 = vadd.xlane.f32.xlu0 %v618_v17 }
 0x407   :  { %v1461_v18 = vpop.eup %1460 }
 0x408   :  { %646 = vadd.xlane.f32.xlu1 %v645_v19  ;;  %v640_v20 = vsel %vm1689_vm4, %v1461_v18, 0.0  ;;  %v1049_v19 = vld [vmem:[#allocation5 + $0x70] sm:$0xff] }
 0x409   :  { %v642_v21 = vsel %vm555_vm2, %v640_v20, 0.0 }
 0x40a   :  { %643 = vadd.xlane.f32.xlu0 %v642_v21  ;;  %v1047_v21 = vld [vmem:[#allocation5 + $0x50] sm:$0xff] }
 0x419   :  { %911 = vrot.lane.b32.xlu1 %v175_v22, %s1559_s0 }
 0x420   :  { %913 = vrot.lane.b32.xlu0 %v181_v7, %s1559_s0 }
 0x485   :  { %v599_v23 = vpop.xlane.xlu1 %598 }
 0x486   :  { %1462 = vrcp.f32 %v599_v23 }
 0x487   :  { %v596_v24 = vpop.xlane.xlu0 %595 }
 0x488   :  { %1464 = vrcp.f32 %v596_v24 }
 0x489   :  { %v575_v25 = vpop.xlane.xlu1 %574 }
 0x48a   :  { %1466 = vrcp.f32 %v575_v25 }
 0x48b   :  { %v572_v26 = vpop.xlane.xlu0 %571 }
 0x48c   :  { %1468 = vrcp.f32 %v572_v26 }
 0x48d   :  { %v623_v27 = vpop.xlane.xlu1 %622 }
 0x48e   :  { %1470 = vrcp.f32 %v623_v27 }
 0x48f   :  { %v620_v29 = vpop.xlane.xlu0 %619 }
 0x490   :  { %1472 = vrcp.f32 %v620_v29 }
 0x491   :  { %v647_v31 = vpop.xlane.xlu1 %646 }
 0x492   :  { %1474 = vrcp.f32 %v647_v31  ;;  %v1036_v31 = vsub.s32 3, %v1606_v30 }
 0x493   :  { %v644_v33 = vpop.xlane.xlu0 %643  ;;  %v1463_v48 = vpop.eup %1462 }
 0x494   :  { %1476 = vrcp.f32 %v644_v33  ;;  %v603_v37 = vmul.f32 %v1463_v48, %v593_v60  ;;  %v1042_v33 = vsub.s32 4, %v1606_v30  ;;  %v1037_v48 = vrot.slane %v1609_v32, %v1036_v31 }
 0x495   :  { %v1465_v34 = vpop.eup %1464  ;;  %v912_v45 = vpop.permute.xlu1 %911 }
 0x496   :  { %v602_v35 = vmul.f32 %v1465_v34, %v592_v3  ;;  %v1005_v3 = vrot.slane %v1609_v32, %v1004_v28 }
 0x497   :  { %v914_v36 = vpop.permute.xlu0 %913  ;;  %v1467_v38 = vpop.eup %1466 }
 0x498   :  { %1371 = vmatprep.mubr.msk.f32.mxu0 %vm555_vm2, %v602_v35  ;;  %1388 = vmatprep.subr.mxu1 %v914_v36  ;;  %v579_v41 = vmul.f32 %v1467_v38, %v569_v4 }
 0x499   :  { %v1469_v39 = vpop.eup %1468  ;;  %1372 = vmatmul.mubr.msk.f32.vlgmr.msra.gmra.mxu0 %vm555_vm2, %v603_v37 }
 0x49a   :  { %1382 = vmatpush3.msra.mxu0 %v181_v7  ;;  %v578_v40 = vmul.f32 %v1469_v39, %v568_v10 }
 0x49b   :  { %1383 = vmatprep.subr.mxu0 %v175_v22  ;;  %v1471_v42 = vpop.eup %1470 }
 0x49c   :  { %1384 = vmatpush3.msra.mxu0 %v175_v22  ;;  %1378 = vmatprep.mubr.msk.f32.mxu1 %vm555_vm2, %v578_v40  ;;  %v627_v47 = vmul.f32 %v1471_v42, %v617_v11  ;;  %v1046_v22 = vld [vmem:[#allocation5 + $0x40] sm:$0xff] }
 0x49d   :  { %v1473_v43 = vpop.eup %1472  ;;  %1379 = vmatmul.mubr.msk.f32.vlgmr.msra.gmra.mxu1 %vm555_vm2, %v579_v41  ;;  %1395 = vmatprep.subr.mxu0 %v1049_v19 }
 0x49e   :  { %1389 = vmatpush3.msra.mxu1 %v914_v36  ;;  %v626_v46 = vmul.f32 %v1473_v43, %v616_v15  ;;  %v1043_v36 = vrot.slane %v1609_v32, %v1042_v33  ;;  %v1152_v43 = vld [vmem:[#allocation5 + $0xf0] sm:$0xff] }
 0x49f   :  { %1390 = vmatprep.subr.mxu1 %v912_v45  ;;  %v1475_v49 = vpop.eup %1474 }
 0x4a0   :  { %1391 = vmatpush3.msra.mxu1 %v912_v45  ;;  %1385 = vmatprep.mubr.msk.f32.mxu0 %vm555_vm2, %v626_v46  ;;  %v651_v52 = vmul.f32 %v1475_v49, %v641_v16  ;;  %v1151_v45 = vld [vmem:[#allocation5 + $0xe0] sm:$0xff]  ;;  %v1150_v46 = vld [vmem:[#allocation5 + $0xd0] sm:$0xff] }
 0x4a1   :  { %v1477_v50 = vpop.eup %1476  ;;  %1386 = vmatmul.mubr.msk.f32.vlgmr.msra.gmra.mxu0 %vm555_vm2, %v627_v47  ;;  %1406 = vmatprep.subr.mxu1 %v1152_v43  ;;  %v1149_v47 = vld [vmem:[#allocation5 + $0xc0] sm:$0xff]  ;;  %v1148_v49 = vld [vmem:[#allocation5 + $0xb0] sm:$0xff] }
 0x4a2   :  { %v650_v51 = vmul.f32 %v1477_v50, %v640_v20  ;;  %1396 = vmatpush3.msra.mxu0 %v1049_v19  ;;  %v1048_v20 = vld [vmem:[#allocation5 + $0x60] sm:$0xff] }
 0x4a3   :  { %1397 = vmatprep.subr.mxu0 %v1048_v20  ;;  %v1147_v50 = vld [vmem:[#allocation5 + $0xa0] sm:$0xff] }
 0x4a4   :  { %1392 = vmatprep.mubr.msk.f32.mxu1 %vm555_vm2, %v650_v51  ;;  %1398 = vmatpush3.msra.mxu0 %v1048_v20  ;;  %v1146_v51 = vld [vmem:[#allocation5 + $0x90] sm:$0xff] }
 0x4a5   :  { %1393 = vmatmul.mubr.msk.f32.vlgmr.msra.gmra.mxu1 %vm555_vm2, %v651_v52  ;;  %1399 = vmatprep.subr.mxu0 %v1047_v21  ;;  %v1145_v52 = vld [vmem:[#allocation5 + $0x80] sm:$0xff] }
 0x4a6   :  { %1400 = vmatpush3.msra.mxu0 %v1047_v21  ;;  %1407 = vmatpush3.msra.mxu1 %v1152_v43 }
 0x4a7   :  { %1401 = vmatprep.subr.mxu0 %v1046_v22  ;;  %1408 = vmatprep.subr.mxu1 %v1151_v45 }
 0x4a8   :  { %1402 = vmatpush3.msra.mxu0 %v1046_v22  ;;  %1409 = vmatpush3.msra.mxu1 %v1151_v45 }
 0x4a9   :  { %1410 = vmatprep.subr.mxu1 %v1150_v46 }
 0x4aa   :  { %1411 = vmatpush3.msra.mxu1 %v1150_v46 }
 0x4ab   :  { %1412 = vmatprep.subr.mxu1 %v1149_v47 }
 0x4ac   :  { %1413 = vmatpush3.msra.mxu1 %v1149_v47 }
 0x4ad   :  { %1414 = vmatprep.subr.mxu1 %v1148_v49 }
 0x4ae   :  { %1415 = vmatpush3.msra.mxu1 %v1148_v49 }
 0x4af   :  { %1416 = vmatprep.subr.mxu1 %v1147_v50 }
 0x4b0   :  { %1417 = vmatpush3.msra.mxu1 %v1147_v50 }
 0x4b1   :  { %1418 = vmatprep.subr.mxu1 %v1146_v51 }
 0x4b2   :  { %1419 = vmatpush3.msra.mxu1 %v1146_v51 }
 0x4b3   :  { %1420 = vmatprep.subr.mxu1 %v1145_v52 }
 0x4b4   :  { %1421 = vmatpush3.msra.mxu1 %v1145_v52 }
 0x559   :  { %v1373_v53 = vpop.f32.mrf.mxu0 }
 0x55b   :  { %v730_v55 = vpop.f32.mrf.mxu0 }
 0x55d   :  { %v1380_v54 = vpop.f32.mrf.mxu1 }
 0x55e   :  { %v823_v58 = vadd.f32 %v1380_v54, %v1373_v53  ;;  %v1052_v53 = vsub.s32 6, %v1606_v30 }
 0x55f   :  { %v817_v56 = vpop.f32.mrf.mxu1 }
 0x560   :  { %v818_v60 = vadd.f32 %v817_v56, %v730_v55  ;;  %v1053_v54 = vrot.slane %v1609_v32, %v1052_v53 }
 0x561   :  { %v1387_v57 = vpop.f32.mrf.mxu0 }
 0x562   :  { %v908_v61 = vadd.f32 %v1387_v57, %v823_v58 }
 0x563   :  { %v898_v59 = vpop.f32.mrf.mxu0 }
 0x564   :  { %v907_v63 = vadd.f32 %v898_v59, %v818_v60 }
 0x565   :  { %v1394_v62 = vpop.f32.mrf.mxu1 }
 0x566   :  { %v999_v2 = vadd.f32 %v1394_v62, %v908_v61 }
 0x567   :  { %v989_v4 = vpop.f32.mrf.mxu1 }
 0x568   :  { %v1001_v6 = vadd.f32 %v999_v2, %v1595_v1  ;;  %v998_v7 = vadd.f32 %v989_v4, %v907_v63 }
 0x56a   :  { %v1734_v8 = vadd.f32 %v1005_v3, %v1001_v6  ;;  %v1000_v44 = vadd.f32 %v998_v7, %v1593_v0  ;;  %v1155_v7 = vsub.s32 7, %v1606_v30 }
 0x56c   :  { %v1737_v9 = vadd.f32 %v1005_v3, %v1000_v44  ;;  %v1011_v10 = vsel %vm44_vm0, %v1734_v8, 0.0  ;;  %v1156_v44 = vrot.slane %v1609_v32, %v1155_v7 }
 0x56d   :  { %1012 = vadd.xlane.f32.xlu1 %v1011_v10 }
 0x56e   :  { %v1008_v11 = vsel %vm44_vm0, %v1737_v9, 0.0 }
 0x56f   :  { %1009 = vadd.xlane.f32.xlu0 %v1008_v11 }
 0x5f6   :  { %v1013_v12 = vpop.xlane.xlu1 %1012 }
 0x5f7   :  { %v1015_v5 = vmul.f32 0.03125, %v1013_v12 }
 0x5f8   :  { %v1010_v13 = vpop.xlane.xlu0 %1009 }
 0x5f9   :  { %v1014_v14 = vmul.f32 0.03125, %v1010_v13  ;;  %v1017_v1 = vsub.f32 %v1734_v8, %v1015_v5 }
 0x5fb   :  { %v1016_v15 = vsub.f32 %v1737_v9, %v1014_v14  ;;  %v1019_v17 = vmul.f32 %v1017_v1, %v1017_v1 }
 0x5fd   :  { %v1018_v16 = vmul.f32 %v1016_v15, %v1016_v15  ;;  %v1023_v18 = vsel %vm44_vm0, %v1019_v17, 0.0 }
 0x5ff   :  { %v1020_v0 = vsel %vm44_vm0, %v1018_v16, 0.0 }
 0x600   :  { %1021 = vadd.xlane.f32.xlu0 %v1020_v0 }
 0x604   :  { %1024 = vadd.xlane.f32.xlu0 %v1023_v18 }
 0x689   :  { %v1022_v23 = vpop.xlane.xlu0 %1021 }
 0x68a   :  { %v1026_v24 = vmul.f32 0.03125, %v1022_v23 }
 0x68c   :  { %v1028_v25 = vadd.f32 1e-05, %v1026_v24 }
 0x68d   :  { %v1025_v26 = vpop.xlane.xlu0 %1024 }
 0x68e   :  { %1478 = vrsqrt.f32 %v1028_v25  ;;  %v1027_v27 = vmul.f32 0.03125, %v1025_v26 }
 0x690   :  { %v1029_v29 = vadd.f32 1e-05, %v1027_v27 }
 0x692   :  { %1480 = vrsqrt.f32 %v1029_v29 }
 0x69b   :  { %v1479_v34 = vpop.eup %1478 }
 0x69c   :  { %v1032_v35 = vmul.f32 %v1479_v34, %v1016_v15 }
 0x69e   :  { %v1038_v37 = vmul.f32 %v1037_v48, %v1032_v35 }
 0x69f   :  { %v1481_v38 = vpop.eup %1480 }
 0x6a0   :  { %v1033_v39 = vmul.f32 %v1481_v38, %v1017_v1  ;;  %v1044_v40 = vadd.f32 %v1043_v36, %v1038_v37 }
 0x6a2   :  { %v1039_v41 = vmul.f32 %v1037_v48, %v1033_v39  ;;  %1403 = vmatprep.mubr.msk.f32.mxu0 %vm44_vm0, %v1044_v40 }
 0x6a4   :  { %v1045_v42 = vadd.f32 %v1043_v36, %v1039_v41 }
 0x6a6   :  { %1404 = vmatmul.mubr.msk.f32.vlgmr.msra.gmra.mxu0 %vm44_vm0, %v1045_v42 }
 0x766   :  { %v1405_v55 = vpop.f32.mrf.mxu0 }
 0x767   :  { %v1132_v56 = vadd.f32 %v1405_v55, %v1053_v54 }
 0x768   :  { %v1126_v57 = vpop.f32.mrf.mxu0 }
 0x769   :  { %v1138_v58 = vmul.f32 0.70710677, %v1132_v56  ;;  %v1127_v28 = vadd.f32 %v1126_v57, %v1053_v54  ;;  %v1136_v3 = vmul.f32 0.5, %v1132_v56 }
 0x76b   :  { %1482 = verf.f32 %v1138_v58  ;;  %v1137_v59 = vmul.f32 0.70710677, %v1127_v28  ;;  %v1135_v63 = vmul.f32 0.5, %v1127_v28 }
 0x76d   :  { %1484 = verf.f32 %v1137_v59 }
 0x778   :  { %v1483_v60 = vpop.eup %1482 }
 0x779   :  { %v1142_v62 = vadd.f32 1.0, %v1483_v60 }
 0x77a   :  { %v1485_v61 = vpop.eup %1484 }
 0x77b   :  { %v1141_v2 = vadd.f32 1.0, %v1485_v61  ;;  %v1144_v6 = vmul.f32 %v1142_v62, %v1136_v3 }
 0x77d   :  { %v1143_v4 = vmul.f32 %v1141_v2, %v1135_v63 }
 0x77f   :  { %1422 = vmatprep.mubr.msk.f32.mxu1 %vm1157_vm5, %v1143_v4 }
 0x780   :  { %1423 = vmatmul.mubr.msk.f32.vlgmr.msra.gmra.mxu1 %vm1157_vm5, %v1144_v6 }
 0x840   :  { %v1424_v10 = vpop.f32.mrf.mxu1 }
 0x841   :  { %v1236_v11 = vadd.f32 %v1424_v10, %v1156_v44 }
 0x842   :  { %v1230_v12 = vpop.f32.mrf.mxu1 }
 0x843   :  { %v1240_v5 = vadd.f32 %v1236_v11, %v1734_v8  ;;  %v1231_v13 = vadd.f32 %v1230_v12, %v1156_v44 }
 0x845   :  { %1242 = vst.msk [vmem:[#allocation7 + $0x8] sm:$0xff] %vm44_vm0, %v1240_v5  ;;  %v1239_v14 = vadd.f32 %v1231_v13, %v1737_v9 }
 0x847   :  { %1241 = vst.msk [vmem:[#allocation7] sm:$0xff] %vm44_vm0, %v1239_v14 }
 0x848   :  { %1537 = shalt.err (!%p1534_p0)
}
 0x849   :  { %1254 = dma.vmem_to_hbm [thread:$0]  %s1249_s3, 256, %s1769_s2, [#allocation4], %s1553_s12, %s1553_s12, %s1554_s13  }
 0x84a   :  { %1550 = dma.done.wait [#allocation4], 256  }
 0x84b   :  { %1551 = vsyncadd [#allocation4], 4294967040 }
 0x84c   :  { %1258 = vsyncpa [#allocation3], 1 }
 0x84d   :  { %1259 = vsyncpa [#allocation6], 1 }
 0x84e   :  { %1260 = vsyncpa [#allocation4], 1 }

</bundles_post_ra>
